<compile_context>
chip_gen: v5e
topology: v5e:2x2
jax: 0.10.0
libtpu: 0.0.40
codegen_flags: <defaults>
</compile_context>

<pallas_src>
import functools

import jax
import jax.numpy as jnp
from jax.experimental import pallas as pl
from jax.experimental.pallas import tpu as pltpu


def _round_up(x, m):
    return ((x + m - 1) // m) * m


def _gru_fc_kernel(xh_ref, wf_ref, whn_ref, bc_ref, bhn_ref, out_ref, *, hp):
    """One M-tile of the GRU cell (func_type='fc').

    xh_ref : (tm, Hp+In)  bf16, columns = [hx zero-padded to Hp | x]
    wf_ref : (Hp+In, 3*Hp) bf16 fused weight, per-gate columns padded to Hp:
               cols [0:Hp)    r : rows[0:H)=w_hh_r.T, rows[Hp:Hp+In)=w_ih_r.T
               cols [Hp:2Hp)  z : rows[0:H)=w_hh_z.T, rows[Hp:Hp+In)=w_ih_z.T
               cols [2Hp:3Hp) n : rows[0:Hp)=0,       rows[Hp:Hp+In)=w_ih_n.T
    whn_ref: (Hp, Hp)  bf16, w_hh_n.T (rows/cols zero-padded H->Hp)
    bc_ref : (1, 3*Hp) f32, [b_ih_r+b_hh_r | b_ih_z+b_hh_z | b_ih_n]
    bhn_ref: (1, Hp)   f32, b_hh_n
    out_ref: (tm, Hp)  f32 (lane-dense; wrapper slices the real H columns)
    """
    xh = xh_ref[...]                              # (tm, Hp+In), bf16
    hx_b = xh[:, :hp]                             # 128-aligned slice, bf16
    hx = hx_b.astype(jnp.float32)                 # f32 copy for the blend

    # Per-gate matmuls on static 128-aligned weight-ref slices; each (tm, Hp)
    # result is consumed immediately (no (tm, 3*Hp) live intermediate).
    r = jax.nn.sigmoid(
        jnp.dot(xh, wf_ref[:, :hp], preferred_element_type=jnp.float32)
        + bc_ref[:, :hp])
    z = jax.nn.sigmoid(
        jnp.dot(xh, wf_ref[:, hp:2 * hp], preferred_element_type=jnp.float32)
        + bc_ref[:, hp:2 * hp])
    i_n = (jnp.dot(xh, wf_ref[:, 2 * hp:], preferred_element_type=jnp.float32)
           + bc_ref[:, 2 * hp:])
    h_n = (jnp.dot(hx_b, whn_ref[...], preferred_element_type=jnp.float32)
           + bhn_ref[...])
    n = jnp.tanh(i_n + r * h_n)

    # z*hx + (1-z)*n == hx + (1-z)*(n-hx)   (one fewer vmul)
    out_ref[...] = (hx + (1.0 - z) * (n - hx)).astype(out_ref.dtype)


def prepare_gru_fc_params(w_ih, w_hh, b_ih, b_hh):
    """One-time parameter prep (transpose / gate-pad / K-fuse / bias combine).

    w_ih: (3H, input_size), w_hh: (3H, H), b_ih/b_hh: (3H,)
    """
    hidden = w_hh.shape[1]
    in_size = w_ih.shape[1]
    hp = _round_up(hidden, 128)
    kf = hp + in_size                      # fused contraction dim: [hx_p | x]

    wih = jnp.transpose(w_ih.astype(jnp.float32)).reshape(in_size, 3, hidden)
    whh = jnp.transpose(w_hh.astype(jnp.float32)).reshape(hidden, 3, hidden)

    wf = jnp.zeros((kf, 3 * hp), jnp.float32)
    # hx-side rows (0..H): r and z gates only (n-gate hx part stays separate).
    wf = wf.at[:hidden, 0:hidden].set(whh[:, 0, :])
    wf = wf.at[:hidden, hp:hp + hidden].set(whh[:, 1, :])
    # x-side rows (Hp..Hp+In): all three gates.
    wf = wf.at[hp:, 0:hidden].set(wih[:, 0, :])
    wf = wf.at[hp:, hp:hp + hidden].set(wih[:, 1, :])
    wf = wf.at[hp:, 2 * hp:2 * hp + hidden].set(wih[:, 2, :])

    whn = jnp.zeros((hp, hp), jnp.float32).at[:hidden, :hidden].set(whh[:, 2, :])

    b_ih3 = b_ih.astype(jnp.float32).reshape(3, hidden)
    b_hh3 = b_hh.astype(jnp.float32).reshape(3, hidden)
    bc = jnp.zeros((1, 3 * hp), jnp.float32)
    bc = bc.at[0, 0:hidden].set(b_ih3[0] + b_hh3[0])
    bc = bc.at[0, hp:hp + hidden].set(b_ih3[1] + b_hh3[1])
    bc = bc.at[0, 2 * hp:2 * hp + hidden].set(b_ih3[2])
    bhn = jnp.zeros((1, hp), jnp.float32).at[0, :hidden].set(b_hh3[2])

    return {
        "wf": wf.astype(jnp.bfloat16),       # bf16 MXU operands
        "whn": whn.astype(jnp.bfloat16),
        "bc": bc, "bhn": bhn,                # biases stay f32 (post-matmul add)
        "hidden": hidden, "hp": hp, "input_size": in_size, "kf": kf,
    }


def _choose_m_tile(m):
    """MXU-aligned M tile: multiple of 256 once M is big enough, small enough
    for >= 2 grid steps (v7x megacore) and a bounded VMEM working set."""
    m8 = _round_up(m, 8)
    if m8 <= 256:
        return m8              # single tile; VPU/EUP work scales with rows
    if m8 <= 2048:
        return 256             # 2..8 grid steps, 256-row MXU pass aligned
    return 512


def gru_cell_fc(x, hx, params, *, nodes):
    """Pallas GRUCell forward, func_type='fc'.

    x : (batch, nodes * input_size)
    hx: (batch, nodes * hidden_size)
    params: output of prepare_gru_fc_params (call once, reuse every step)
    returns: (batch, nodes * hidden_size)
    """
    hidden = params["hidden"]
    hp = params["hp"]
    in_size = params["input_size"]
    kf = params["kf"]

    batch = x.shape[0]
    m = batch * nodes

    x2 = x.reshape(m, in_size).astype(jnp.float32)
    h2 = hx.reshape(m, hidden).astype(jnp.float32)
    h2p = jnp.pad(h2, ((0, 0), (0, hp - hidden)))        # lane-dense hx
    xh = jnp.concatenate([h2p, x2], axis=1)              # (m, kf), hx first

    tm = _choose_m_tile(m)
    m_pad = _round_up(m, tm)
    xh = jnp.pad(xh, ((0, m_pad - m), (0, 0))).astype(jnp.bfloat16)

    # VMEM budget: resident bf16 weights + double-buffered I/O tiles + f32
    # working set.  Only raise the scoped limit when actually needed
    # (v7x: 64 MiB physical / 32 MiB scoped default).
    est = (kf * 3 * hp * 2 + hp * hp * 2 + 4 * hp * 4            # weights/bias
           + 2 * tm * kf * 2 + 2 * tm * hp * 4                   # xh/out bufs
           + 8 * tm * hp * 4)                                    # live f32 work
    vmem_limit = int(min(est * 3 // 2, 60 << 20)) if est > (24 << 20) else None

    kernel = functools.partial(_gru_fc_kernel, hp=hp)

    out_p = pl.pallas_call(
        kernel,
        out_shape=jax.ShapeDtypeStruct((m_pad, hp), jnp.float32),
        grid_spec=pltpu.PrefetchScalarGridSpec(
            num_scalar_prefetch=0,
            grid=(m_pad // tm,),
            in_specs=[
                pl.BlockSpec((tm, kf), lambda i: (i, 0)),
                # Weights / biases: constant block index -> VMEM-resident.
                pl.BlockSpec((kf, 3 * hp), lambda i: (0, 0)),
                pl.BlockSpec((hp, hp), lambda i: (0, 0)),
                pl.BlockSpec((1, 3 * hp), lambda i: (0, 0)),
                pl.BlockSpec((1, hp), lambda i: (0, 0)),
            ],
            out_specs=pl.BlockSpec((tm, hp), lambda i: (i, 0)),
        ),
        compiler_params=pltpu.CompilerParams(
            dimension_semantics=("parallel",),
            vmem_limit_bytes=vmem_limit),
    )(xh, params["wf"], params["whn"], params["bc"], params["bhn"])

    return out_p[:m, :hidden].reshape(batch, nodes * hidden)


def _reference(x, hx, w_ih, w_hh, b_ih, b_hh, *, nodes):
    """Pure-JAX f32 reference mirroring the PyTorch forward (func_type='fc')."""
    batch = x.shape[0]
    x2 = x.reshape(batch * nodes, -1)
    h2 = hx.reshape(batch * nodes, -1)
    gi = x2 @ w_ih.T + b_ih
    gh = h2 @ w_hh.T + b_hh
    i_r, i_i, i_n = jnp.split(gi, 3, axis=1)
    h_r, h_i, h_n = jnp.split(gh, 3, axis=1)
    r = jax.nn.sigmoid(i_r + h_r)
    z = jax.nn.sigmoid(i_i + h_i)
    n = jnp.tanh(i_n + r * h_n)
    return (z * h2 + (1.0 - z) * n).reshape(batch, -1)


if __name__ == "__main__":
    # Small shapes consistent with the module (func_type='fc').
    batch = 2
    nodes = 4
    input_size = 8
    hidden_size = 32

    key = jax.random.PRNGKey(0)
    k_x, k_h, k_wih, k_whh, k_bih, k_bhh = jax.random.split(key, 6)

    # Deterministic param init mimicking _reset_param: U(-std, std), std=1/sqrt(H)
    std = 1.0 / (hidden_size ** 0.5)
    w_ih = jax.random.uniform(k_wih, (3 * hidden_size, input_size),
                              minval=-std, maxval=std, dtype=jnp.float32)
    w_hh = jax.random.uniform(k_whh, (3 * hidden_size, hidden_size),
                              minval=-std, maxval=std, dtype=jnp.float32)
    b_ih = jax.random.uniform(k_bih, (3 * hidden_size,),
                              minval=-std, maxval=std, dtype=jnp.float32)
    b_hh = jax.random.uniform(k_bhh, (3 * hidden_size,),
                              minval=-std, maxval=std, dtype=jnp.float32)

    x = jax.random.normal(k_x, (batch, nodes * input_size), dtype=jnp.float32)
    hx = jax.random.normal(k_h, (batch, nodes * hidden_size), dtype=jnp.float32)

    # One-time parameter preparation (transpose / gate-pad / K-fuse / biases).
    params = prepare_gru_fc_params(w_ih, w_hh, b_ih, b_hh)
    params = jax.tree_util.tree_map(jax.block_until_ready, params)

    out = gru_cell_fc(x, hx, params, nodes=nodes)
    out = jax.block_until_ready(out)

    ref = _reference(x, hx, w_ih, w_hh, b_ih, b_hh, nodes=nodes)
    assert out.shape == (batch, nodes * hidden_size), out.shape
    # Tolerance loosened vs. the pure-f32 version: MXU operands are bf16
    # (accumulation and all elementwise math remain f32).
    assert jnp.allclose(out, ref, atol=5e-2, rtol=5e-2), (
        "mismatch vs reference, max abs err = "
        f"{float(jnp.max(jnp.abs(out - ref)))}")

    print("KERNEL_OK")
</pallas_src>

<mosaic_0001>
module attributes {stable_mosaic.version = 11 : i64} {
  func.func @_gru_fc_kernel(%arg0: i32, %arg1: memref<8x136xbf16, #tpu.memory_space<vmem>>, %arg2: memref<136x384xbf16, #tpu.memory_space<vmem>>, %arg3: memref<128x128xbf16, #tpu.memory_space<vmem>>, %arg4: memref<1x384xf32, #tpu.memory_space<vmem>>, %arg5: memref<1x128xf32, #tpu.memory_space<vmem>>, %arg6: memref<8x128xf32, #tpu.memory_space<vmem>>) attributes {dimension_semantics = [#tpu.dimension_semantics<parallel>], iteration_bounds = array<i64: 1>, scalar_prefetch = 0 : i64, scratch_operands = 0 : i64, tpu.core_type = #tpu.core_type<tc>, window_params = [{transform_indices = @transform_0, window_bounds = array<i64: 8, 136>}, {pipeline_mode = #tpu.pipeline_mode<synchronous>, transform_indices = @transform_1, window_bounds = array<i64: 136, 384>}, {pipeline_mode = #tpu.pipeline_mode<synchronous>, transform_indices = @transform_2, window_bounds = array<i64: 128, 128>}, {pipeline_mode = #tpu.pipeline_mode<synchronous>, transform_indices = @transform_3, window_bounds = array<i64: 1, 384>}, {pipeline_mode = #tpu.pipeline_mode<synchronous>, transform_indices = @transform_4, window_bounds = array<i64: 1, 128>}, {transform_indices = @transform_5, window_bounds = array<i64: 8, 128>}]} {
    %c0 = arith.constant 0 : index
    %c0_0 = arith.constant 0 : index
    %0 = vector.load %arg1[%c0, %c0_0] : memref<8x136xbf16, #tpu.memory_space<vmem>>, vector<8x136xbf16>
    %1 = vector.extract_strided_slice %0 {offsets = [0, 0], sizes = [8, 128], strides = [1, 1]} : vector<8x136xbf16> to vector<8x128xbf16>
    %2 = arith.extf %1 : vector<8x128xbf16> to vector<8x128xf32>
    %c0_1 = arith.constant 0 : index
    %c0_2 = arith.constant 0 : index
    %3 = vector.load %arg2[%c0_1, %c0_2] : memref<136x384xbf16, #tpu.memory_space<vmem>>, vector<136x128xbf16>
    %cst = arith.constant dense<0.000000e+00> : vector<8x128xf32>
    %4 = tpu.matmul %0, %3, %cst {dimension_numbers = #tpu.dot_dimension_numbers<[1], [0], [0], [1], [0, 0, 1, 1], [], []>} : vector<8x136xbf16>, vector<136x128xbf16>, vector<8x128xf32> -> vector<8x128xf32>
    %c0_3 = arith.constant 0 : index
    %c0_4 = arith.constant 0 : index
    %5 = vector.load %arg4[%c0_3, %c0_4] : memref<1x384xf32, #tpu.memory_space<vmem>>, vector<1x128xf32>
    %6 = vector.broadcast %5 : vector<1x128xf32> to vector<8x128xf32>
    %7 = arith.addf %4, %6 : vector<8x128xf32>
    %8 = arith.negf %7 : vector<8x128xf32>
    %9 = math.exp %8 : vector<8x128xf32>
    %cst_5 = arith.constant 1.000000e+00 : f32
    %10 = vector.broadcast %cst_5 : f32 to vector<8x128xf32>
    %11 = arith.addf %10, %9 : vector<8x128xf32>
    %12 = arith.divf %10, %11 : vector<8x128xf32>
    %c0_6 = arith.constant 0 : index
    %c128 = arith.constant 128 : index
    %13 = vector.load %arg2[%c0_6, %c128] : memref<136x384xbf16, #tpu.memory_space<vmem>>, vector<136x128xbf16>
    %cst_7 = arith.constant dense<0.000000e+00> : vector<8x128xf32>
    %14 = tpu.matmul %0, %13, %cst_7 {dimension_numbers = #tpu.dot_dimension_numbers<[1], [0], [0], [1], [0, 0, 1, 1], [], []>} : vector<8x136xbf16>, vector<136x128xbf16>, vector<8x128xf32> -> vector<8x128xf32>
    %c0_8 = arith.constant 0 : index
    %c128_9 = arith.constant 128 : index
    %15 = vector.load %arg4[%c0_8, %c128_9] : memref<1x384xf32, #tpu.memory_space<vmem>>, vector<1x128xf32>
    %16 = vector.broadcast %15 : vector<1x128xf32> to vector<8x128xf32>
    %17 = arith.addf %14, %16 : vector<8x128xf32>
    %18 = arith.negf %17 : vector<8x128xf32>
    %19 = math.exp %18 : vector<8x128xf32>
    %cst_10 = arith.constant 1.000000e+00 : f32
    %20 = vector.broadcast %cst_10 : f32 to vector<8x128xf32>
    %21 = arith.addf %20, %19 : vector<8x128xf32>
    %22 = arith.divf %20, %21 : vector<8x128xf32>
    %c0_11 = arith.constant 0 : index
    %c256 = arith.constant 256 : index
    %23 = vector.load %arg2[%c0_11, %c256] : memref<136x384xbf16, #tpu.memory_space<vmem>>, vector<136x128xbf16>
    %cst_12 = arith.constant dense<0.000000e+00> : vector<8x128xf32>
    %24 = tpu.matmul %0, %23, %cst_12 {dimension_numbers = #tpu.dot_dimension_numbers<[1], [0], [0], [1], [0, 0, 1, 1], [], []>} : vector<8x136xbf16>, vector<136x128xbf16>, vector<8x128xf32> -> vector<8x128xf32>
    %c0_13 = arith.constant 0 : index
    %c256_14 = arith.constant 256 : index
    %25 = vector.load %arg4[%c0_13, %c256_14] : memref<1x384xf32, #tpu.memory_space<vmem>>, vector<1x128xf32>
    %26 = vector.broadcast %25 : vector<1x128xf32> to vector<8x128xf32>
    %27 = arith.addf %24, %26 : vector<8x128xf32>
    %c0_15 = arith.constant 0 : index
    %c0_16 = arith.constant 0 : index
    %28 = vector.load %arg3[%c0_15, %c0_16] : memref<128x128xbf16, #tpu.memory_space<vmem>>, vector<128x128xbf16>
    %cst_17 = arith.constant dense<0.000000e+00> : vector<8x128xf32>
    %29 = tpu.matmul %1, %28, %cst_17 {dimension_numbers = #tpu.dot_dimension_numbers<[1], [0], [0], [1], [0, 0, 1, 1], [], []>} : vector<8x128xbf16>, vector<128x128xbf16>, vector<8x128xf32> -> vector<8x128xf32>
    %c0_18 = arith.constant 0 : index
    %c0_19 = arith.constant 0 : index
    %30 = vector.load %arg5[%c0_18, %c0_19] : memref<1x128xf32, #tpu.memory_space<vmem>>, vector<1x128xf32>
    %31 = vector.broadcast %30 : vector<1x128xf32> to vector<8x128xf32>
    %32 = arith.addf %29, %31 : vector<8x128xf32>
    %33 = arith.mulf %12, %32 : vector<8x128xf32>
    %34 = arith.addf %27, %33 : vector<8x128xf32>
    %35 = math.tanh %34 : vector<8x128xf32>
    %cst_20 = arith.constant 1.000000e+00 : f32
    %36 = vector.broadcast %cst_20 : f32 to vector<8x128xf32>
    %37 = arith.subf %36, %22 : vector<8x128xf32>
    %38 = arith.subf %35, %2 : vector<8x128xf32>
    %39 = arith.mulf %37, %38 : vector<8x128xf32>
    %40 = arith.addf %2, %39 : vector<8x128xf32>
    %c0_21 = arith.constant 0 : index
    %c0_22 = arith.constant 0 : index
    %41 = vector.load %arg6[%c0_21, %c0_22] : memref<8x128xf32, #tpu.memory_space<vmem>>, vector<8x128xf32>
    tpu.vector_store %arg6[%c0_21, %c0_22], %40 {strides = array<i32>} : memref<8x128xf32, #tpu.memory_space<vmem>>, vector<8x128xf32>,
    return
  }
  func.func @transform_0(%arg0: i32) -> (i32, i32) {
    %c0_i32 = arith.constant 0 : i32
    %c0_i32_0 = arith.constant 0 : i32
    return %arg0, %c0_i32 : i32, i32
  }
  func.func @transform_1(%arg0: i32) -> (i32, i32) {
    %c0_i32 = arith.constant 0 : i32
    %c0_i32_0 = arith.constant 0 : i32
    %c0_i32_1 = arith.constant 0 : i32
    return %c0_i32, %c0_i32_0 : i32, i32
  }
  func.func @transform_2(%arg0: i32) -> (i32, i32) {
    %c0_i32 = arith.constant 0 : i32
    %c0_i32_0 = arith.constant 0 : i32
    %c0_i32_1 = arith.constant 0 : i32
    return %c0_i32, %c0_i32_0 : i32, i32
  }
  func.func @transform_3(%arg0: i32) -> (i32, i32) {
    %c0_i32 = arith.constant 0 : i32
    %c0_i32_0 = arith.constant 0 : i32
    %c0_i32_1 = arith.constant 0 : i32
    return %c0_i32, %c0_i32_0 : i32, i32
  }
  func.func @transform_4(%arg0: i32) -> (i32, i32) {
    %c0_i32 = arith.constant 0 : i32
    %c0_i32_0 = arith.constant 0 : i32
    %c0_i32_1 = arith.constant 0 : i32
    return %c0_i32, %c0_i32_0 : i32, i32
  }
  func.func @transform_5(%arg0: i32) -> (i32, i32) {
    %c0_i32 = arith.constant 0 : i32
    %c0_i32_0 = arith.constant 0 : i32
    return %arg0, %c0_i32 : i32, i32
  }
}

</mosaic_0001>

<bundles_post_ra>
// kernel: tpu_custom_call.1
= control target key start
LH: loop header
LB: loop body
LE: loop exit
PB: predicated region body
PF: predicated region fallthrough
CT: control target
= control target key end

     0   :  { %10 = vsyncpa [#allocation3], 0  ;;  %s937_s0 = inlined_call_operand.hbm [shape: bf16[8,136], index: 0, kind: input, shape index: {}]   ;;  %s938_s1 = inlined_call_operand.hbm [shape: bf16[136,384], index: 1, kind: input, shape index: {}]   ;;  %s939_s2 = inlined_call_operand.hbm [shape: bf16[128,128], index: 2, kind: input, shape index: {}]   ;;  %s940_s3 = inlined_call_operand.hbm [shape: f32[1,384], index: 3, kind: input, shape index: {}]   ;;  %s941_s4 = inlined_call_operand.vmem [shape: f32[1,128], index: 4, kind: input, shape index: {}]   ;;  %s942_s5 = inlined_call_operand.hbm [shape: f32[8,128], index: 5, kind: output, shape index: {}]  }
   0x1   :  { %11 = vsyncpa [#allocation6], 0 }
   0x2   :  { %12 = vsyncpa [#allocation9], 0  ;;  %s29_s20 = sshll.u32 %s938_s1, 4  ;;  %s30_s20 = int_to_ptr.hbm [resolvable:$true] %s29_s20 }
   0x3   :  { %13 = vsyncpa [#allocation4], 0  ;;  %s859_s21 = smov [#allocation5]   ;;  %s19_s25 = sshll.u32 %s937_s0, 4  ;;  %s20_s25 = int_to_ptr.hbm [resolvable:$true] %s19_s25 }
   0x4   :  { %s31_s22 = sshll.u32 %s859_s21, 4  ;;  %s860_s26 = smov 192   ;;  %s32_s22 = int_to_ptr.vmem [resolvable:$true] %s31_s22 }
   0x5   :  { %s861_s27 = smov 12   ;;  %s862_s28 = smov [#allocation2]  }
   0x6   :  { %37 = dma.hbm_to_vmem [thread:$0]  %s30_s20, 3264, %s32_s22, [#allocation6], %s860_s26, %s860_s26, %s861_s27  }
   0x7   :  { %s21_s29 = sshll.u32 %s862_s28, 4  ;;  %s42_s7 = sshll.u32 %s939_s2, 4  ;;  %s22_s29 = int_to_ptr.vmem [resolvable:$true] %s21_s29  ;;  %s43_s7 = int_to_ptr.hbm [resolvable:$true] %s42_s7 }
   0x8   :  { %24 = dma.hbm_to_vmem [thread:$0]  %s20_s25, 128, %s22_s29, [#allocation3]  }
   0x9   :  { %s863_s1 = smov [#allocation7]   ;;  %s56_s0 = sshll.u32 %s940_s3, 4  ;;  %s57_s0 = int_to_ptr.hbm [resolvable:$true] %s56_s0 }
   0xa   :  { %s44_s8 = sshll.u32 %s863_s1, 4  ;;  %s864_s11 = smov 64   ;;  %s45_s8 = int_to_ptr.vmem [resolvable:$true] %s44_s8 }
   0xb   :  { %s865_s12 = smov 4   ;;  %s866_s13 = smov [#allocation8]  }
   0xc   :  { %50 = dma.hbm_to_vmem [thread:$0]  %s43_s7, 1024, %s45_s8, [#allocation6], %s864_s11, %s864_s11, %s865_s12  }
   0xd   :  { %s58_s14 = sshll.u32 %s866_s13, 4  ;;  %s59_s14 = int_to_ptr.vmem [resolvable:$true] %s58_s14 }
   0xe   :  { %61 = dma.hbm_to_vmem [thread:$0]  %s57_s0, 48, %s59_s14, [#allocation9]  }
   0xf   :  { %851 = dma.done.wait [#allocation3], 128  }
  0x10   :  { %852 = vsyncadd [#allocation3], 4294967168 }
  0x11   :  { %853 = dma.done.wait [#allocation6], 4288  }
  0x12   :  { %854 = vsyncadd [#allocation6], 4294963008 }
  0x13   :  { %855 = dma.done.wait [#allocation9], 48  }
  0x14   :  { %856 = vsyncadd [#allocation9], 4294967248  ;;  %v573_v0 = vld [vmem:[#allocation5 + $0xa8] sm:$0xf]  ;;  %v683_v1 = vld [vmem:[#allocation5 + $0xb0] sm:$0xf0] }
  0x15   :  { %v607_v2 = vld [vmem:[#allocation5 + $0xac] sm:$0xf]  ;;  %v574_v3 = vor.u32 %v683_v1, %v573_v0  ;;  %v691_v4 = vld [vmem:[#allocation5 + $0xb4] sm:$0xf0]  ;;  %v569_v5 = vld [vmem:[#allocation5 + $0x90] sm:$0xf] }
  0x16   :  { %v682_v6 = vld [vmem:[#allocation5 + $0x98] sm:$0xf0]  ;;  %v608_v7 = vor.u32 %v691_v4, %v607_v2  ;;  %v603_v8 = vld [vmem:[#allocation5 + $0x94] sm:$0xf]  ;;  %v690_v9 = vld [vmem:[#allocation5 + $0x9c] sm:$0xf0] }
  0x17   :  { %169 = vmatpush.bf16.msra.mxu0 %v574_v3  ;;  %v570_v10 = vor.u32 %v682_v6, %v569_v5  ;;  %v604_v11 = vor.u32 %v690_v9, %v603_v8  ;;  %v565_v12 = vld [vmem:[#allocation5 + $0x78] sm:$0xf]  ;;  %v681_v13 = vld [vmem:[#allocation5 + $0x80] sm:$0xf0]  ;;  %v599_v14 = vld [vmem:[#allocation5 + $0x7c] sm:$0xf] }
  0x18   :  { %289 = vmatpush.bf16.msra.mxu2 %v608_v7  ;;  %v689_v15 = vld [vmem:[#allocation5 + $0x84] sm:$0xf0]  ;;  %v910_v16 = vld [vmem:[#allocation5 + $0xc0] sm:$0xff]   ;;  %v641_v17 = vld [vmem:[#allocation5 + $0xb0] sm:$0xf]  ;;  %v566_v20 = vor.u32 %v681_v13, %v565_v12  ;;  %vm165_vm0 = vcmask 1043456  }
  0x19   :  { %v143_v18 = vunpack.c.l.b16 %v910_v16  ;;  %v699_v19 = vld [vmem:[#allocation5 + $0xb8] sm:$0xf0]  ;;  %v350_v21 = vld [vmem:[#allocation5 + $0xc8] sm:$0xf]  ;;  %v600_v22 = vor.u32 %v689_v15, %v599_v14  ;;  %v561_v23 = vld [vmem:[#allocation5 + $0x60] sm:$0xf]  ;;  %v268_v2 = vunpack.c.h.b16 %v910_v16 }
  0x1a   :  { %v680_v24 = vld [vmem:[#allocation5 + $0x68] sm:$0xf0]  ;;  %v595_v25 = vld [vmem:[#allocation5 + $0x64] sm:$0xf]  ;;  %v642_v27 = vor.u32 %v699_v19, %v641_v17  ;;  %v388_v28 = vunpack.c.l.b16 %v350_v21  ;;  %v688_v29 = vld [vmem:[#allocation5 + $0x6c] sm:$0xf0] }
  0x1b   :  { %170 = vmatpush.bf16.msra.mxu0 %v570_v10  ;;  %v152_v26 = vpack.c.b16 %v143_v18, %v143_v18  ;;  %v637_v30 = vld [vmem:[#allocation5 + $0x98] sm:$0xf]  ;;  %v698_v31 = vld [vmem:[#allocation5 + $0xa0] sm:$0xf0]  ;;  %v562_v35 = vor.u32 %v680_v24, %v561_v23  ;;  %v557_v36 = vld [vmem:[#allocation5 + $0x48] sm:$0xf]  ;;  %v596_v37 = vor.u32 %v688_v29, %v595_v25  ;;  %v277_v13 = vpack.c.b16 %v268_v2, %v268_v2 }
  0x1c   :  { %290 = vmatpush.bf16.msra.mxu2 %v604_v11  ;;  %v397_v33 = vpack.c.b16 %v388_v28, %v388_v28  ;;  %v707_v34 = vld [vmem:[#allocation7 + $0x38] sm:$0xff]  ;;  %v679_v38 = vld [vmem:[#allocation5 + $0x50] sm:$0xf0]  ;;  %v591_v39 = vld [vmem:[#allocation5 + $0x4c] sm:$0xf]  ;;  %v638_v41 = vor.u32 %v698_v31, %v637_v30  ;;  %vm161_vm1 = vcmask 64512  }
  0x1d   :  { %v167_v32 = vsel %vm165_vm0, %v152_v26, 0  ;;  %v687_v42 = vld [vmem:[#allocation5 + $0x54] sm:$0xf0]  ;;  %v633_v43 = vld [vmem:[#allocation5 + $0x80] sm:$0xf]  ;;  %v558_v47 = vor.u32 %v679_v38, %v557_v36  ;;  %v704_v5 = vld [vmem:[#allocation7 + $0x20] sm:$0xff] }
  0x1e   :  { %189 = vmatpush.bf16.msra.mxu1 %v167_v32  ;;  %v407_v40 = vsel %vm165_vm0, %v397_v33, 0  ;;  %v697_v44 = vld [vmem:[#allocation5 + $0x88] sm:$0xf0]  ;;  %v706_v45 = vld [vmem:[#allocation7 + $0x30] sm:$0xff]  ;;  %v592_v49 = vor.u32 %v687_v42, %v591_v39  ;;  %v553_v50 = vld [vmem:[#allocation5 + $0x30] sm:$0xf] }
  0x1f   :  { %171 = vmatpush.bf16.msra.mxu0 %v566_v20  ;;  %429 = vmatpush.bf16.msra.mxu3 %v407_v40  ;;  %v915_v46 = vld [vmem:[#allocation2] sm:$0xff]  ;;  %v587_v52 = vld [vmem:[#allocation5 + $0x34] sm:$0xf]  ;;  %v634_v53 = vor.u32 %v697_v44, %v633_v43  ;;  %v686_v54 = vld [vmem:[#allocation5 + $0x3c] sm:$0xf0]  ;;  %v287_v20 = vsel %vm165_vm0, %v277_v13, 0 }
  0x20   :  { %291 = vmatpush.bf16.msra.mxu2 %v600_v22  ;;  %v106_v48 = vunpack.c.h.b16 %v915_v46  ;;  %v678_v51 = vld [vmem:[#allocation5 + $0x38] sm:$0xf0]  ;;  %v629_v55 = vld [vmem:[#allocation5 + $0x68] sm:$0xf]  ;;  %v696_v56 = vld [vmem:[#allocation5 + $0x70] sm:$0xf0]  ;;  %v588_v63 = vor.u32 %v686_v54, %v587_v52  ;;  %v105_v14 = vunpack.c.l.b16 %v915_v46 }
  0x21   :  { %v549_v58 = vld [vmem:[#allocation5 + $0x18] sm:$0xf]  ;;  %v554_v60 = vor.u32 %v678_v51, %v553_v50  ;;  %v677_v61 = vld [vmem:[#allocation5 + $0x20] sm:$0xf0]  ;;  %v583_v62 = vld [vmem:[#allocation5 + $0x1c] sm:$0xf]  ;;  %v630_v0 = vor.u32 %v696_v56, %v629_v55 }
  0x22   :  { %409 = vmatpush.bf16.msrb.mxu1 %v642_v27  ;;  %v918_v57 = vpack.c.b16 %v106_v48, %v106_v48  ;;  %v705_v59 = vld [vmem:[#allocation7 + $0x28] sm:$0xff]  ;;  %v685_v1 = vld [vmem:[#allocation5 + $0x24] sm:$0xf0]  ;;  %v625_v3 = vld [vmem:[#allocation5 + $0x50] sm:$0xf]  ;;  %v550_v6 = vor.u32 %v677_v61, %v549_v58  ;;  %v107_v22 = vpack.c.b16 %v105_v14, %v105_v14  ;;  %s531_s18 = sshll.u32 %s942_s5, 4  ;;  %s532_s18 = int_to_ptr.hbm [resolvable:$true] %s531_s18 }
  0x23   :  { %503 = vmatpush.bf16.msrb.mxu3 %v707_v34  ;;  %172 = vmatpush.bf16.msra.mxu0 %v562_v35  ;;  %v695_v4 = vld [vmem:[#allocation5 + $0x58] sm:$0xf0]  ;;  %v584_v7 = vor.u32 %v685_v1, %v583_v62  ;;  %v545_v8 = vld [vmem:[#allocation5] sm:$0xf]  ;;  %v676_v9 = vld [vmem:[#allocation5 + $0x8] sm:$0xf0] }
  0x24   :  { %292 = vmatpush.bf16.msra.mxu2 %v596_v37  ;;  %575 = vmatmul.msk.bf16.vlgmr.msra.gmra.mxu1 %vm161_vm1, %v918_v57  ;;  %v626_v10 = vor.u32 %v695_v4, %v625_v3  ;;  %v579_v11 = vld [vmem:[#allocation5 + $0x4] sm:$0xf]  ;;  %v684_v12 = vld [vmem:[#allocation5 + $0xc] sm:$0xf0]  ;;  %v621_v15 = vld [vmem:[#allocation5 + $0x38] sm:$0xf]  ;;  %v546_v18 = vor.u32 %v676_v9, %v545_v8 }
  0x25   :  { %643 = vmatmul.msk.bf16.vlgmr.msra.gmra.mxu3 %vm161_vm1, %v918_v57  ;;  %v694_v16 = vld [vmem:[#allocation5 + $0x40] sm:$0xf0]  ;;  %v580_v19 = vor.u32 %v684_v12, %v579_v11  ;;  %v617_v23 = vld [vmem:[#allocation5 + $0x20] sm:$0xf]  ;;  %v693_v24 = vld [vmem:[#allocation5 + $0x28] sm:$0xf0] }
  0x26   :  { %410 = vmatpush.bf16.msrb.mxu1 %v638_v41  ;;  %v703_v17 = vld [vmem:[#allocation7 + $0x18] sm:$0xff]  ;;  %v622_v21 = vor.u32 %v694_v16, %v621_v15  ;;  %v702_v25 = vld [vmem:[#allocation7 + $0x10] sm:$0xff]  ;;  %v618_v26 = vor.u32 %v693_v24, %v617_v23  ;;  %v692_v28 = vld [vmem:[#allocation5 + $0x10] sm:$0xf0] }
  0x27   :  { %504 = vmatpush.bf16.msrb.mxu3 %v706_v45  ;;  %173 = vmatpush.bf16.msra.mxu0 %v558_v47  ;;  %v613_v27 = vld [vmem:[#allocation5 + $0x8] sm:$0xf]  ;;  %v701_v29 = vld [vmem:[#allocation7 + $0x8] sm:$0xff]  ;;  %v700_v31 = vld [vmem:[#allocation7] sm:$0xff] }
  0x28   :  { %293 = vmatpush.bf16.msra.mxu2 %v592_v49  ;;  %v614_v30 = vor.u32 %v692_v28, %v613_v27  ;;  %v717_v35 = vld [vmem:[#allocation8] ss:$0 sm:$0xff]  ;;  %v718_v43 = vld [vmem:[#allocation8 + $0x1] ss:$0 sm:$0xff]  ;;  %v719_v58 = vld [vmem:[#allocation8 + $0x2] ss:$0 sm:$0xff] }
  0x2a   :  { %411 = vmatpush.bf16.msrb.mxu1 %v634_v53 }
  0x2b   :  { %505 = vmatpush.bf16.msrb.mxu3 %v705_v59  ;;  %174 = vmatpush.bf16.msra.mxu0 %v554_v60  ;;  %v720_v60 = vld [vmem:[%s941_s4] ss:$0 sm:$0xff]  ;;  %s867_s4 = smov [#allocation10]  }
  0x2c   :  { %294 = vmatpush.bf16.msra.mxu2 %v588_v63  ;;  %s529_s15 = sshll.u32 %s867_s4, 4  ;;  %s530_s15 = int_to_ptr.vmem [resolvable:$true] %s529_s15 }
  0x2e   :  { %412 = vmatpush.bf16.msrb.mxu1 %v630_v0 }
  0x2f   :  { %506 = vmatpush.bf16.msrb.mxu3 %v704_v5  ;;  %175 = vmatpush.bf16.msra.mxu0 %v550_v6 }
  0x30   :  { %295 = vmatpush.bf16.msra.mxu2 %v584_v7 }
  0x32   :  { %413 = vmatpush.bf16.msrb.mxu1 %v626_v10 }
  0x33   :  { %507 = vmatpush.bf16.msrb.mxu3 %v703_v17  ;;  %176 = vmatpush.bf16.msra.mxu0 %v546_v18  ;;  %v82_v18 = vunpack.c.l.bf16 %v915_v46 }
  0x34   :  { %296 = vmatpush.bf16.msra.mxu2 %v580_v19 }
  0x36   :  { %414 = vmatpush.bf16.msrb.mxu1 %v622_v21  ;;  %177 = vmatmul.bf16.vlgmr.msra.gmra.mxu0 %v107_v22 }
  0x37   :  { %309 = vmatpush.bf16.msrb.mxu0 %v287_v20  ;;  %508 = vmatpush.bf16.msrb.mxu3 %v702_v25 }
  0x38   :  { %297 = vmatmul.bf16.vlgmr.msra.gmra.mxu2 %v107_v22 }
  0x3a   :  { %415 = vmatpush.bf16.msrb.mxu1 %v618_v26 }
  0x3b   :  { %509 = vmatpush.bf16.msrb.mxu3 %v701_v29 }
  0x3e   :  { %416 = vmatpush.bf16.msrb.mxu1 %v614_v30 }
  0x3f   :  { %510 = vmatpush.bf16.msrb.mxu3 %v700_v31 }
  0x41   :  { %417 = vmatmul.bf16.vlgmr.msrb.gmra.mxu1 %v107_v22 }
  0x42   :  { %511 = vmatmul.bf16.vlgmr.msrb.gmra.mxu3 %v915_v46 }
  0x46   :  { %609 = vmatmul.msk.bf16.vlgmr.msrb.gmra.mxu0 %vm161_vm1, %v918_v57 }
  0xa1   :  { %v191_v32 = vpop.f32.mrf.mxu1 }
  0xa8   :  { %v431_v34 = vpop.f32.mrf.mxu3 }
  0xa9   :  { %v193_v33 = vpop.f32.mrf.mxu1 }
  0xb0   :  { %v433_v38 = vpop.f32.mrf.mxu3 }
  0xb3   :  { %v178_v36 = vpop.f32.mrf.mxu0 }
  0xb4   :  { %v179_v37 = vadd.f32 %v717_v35, %v178_v36 }
  0xb6   :  { %v192_v39 = vadd.f32 %v191_v32, %v179_v37 }
  0xb8   :  { %v576_v40 = vmul.f32 -1.442695, %v192_v39 }
  0xba   :  { %721 = vpow2.f32 %v576_v40 }
  0xbb   :  { %v298_v41 = vpop.f32.mrf.mxu2  ;;  %v180_v42 = vpop.f32.mrf.mxu0 }
  0xbc   :  { %v299_v47 = vadd.f32 %v718_v43, %v298_v41 }
  0xbe   :  { %v418_v44 = vpop.f32.mrf.mxu1 }
  0xbf   :  { %v419_v3 = vadd.f32 %v719_v58, %v418_v44 }
  0xc0   :  { %v722_v45 = vpop.eup %721 }
  0xc1   :  { %v198_v48 = vadd.f32 1.0, %v722_v45  ;;  %v432_v9 = vadd.f32 %v431_v34, %v419_v3 }
  0xc3   :  { %v300_v49 = vpop.f32.mrf.mxu2  ;;  %723 = vrcp.f32 %v198_v48  ;;  %v311_v50 = vpop.f32.mrf.mxu0  ;;  %v210_v62 = vand.u32 2147483648, %v198_v48  ;;  %v208_v1 = vand.u32 2147483647, %v198_v48  ;;  %vm204_vm3 = vweird.f32 %v198_v48 }
  0xc4   :  { %v312_v51 = vadd.f32 %v311_v50, %v299_v47 }
  0xc5   :  { %v512_v52 = vpop.f32.mrf.mxu3  ;;  %v211_v6 = vor.u32 1.1754944e-38, %v210_v62  ;;  %vm209_vm5 = vcmp.eq.f32.partialorder %v208_v1, 8.507059e+37 }
  0xc6   :  { %v420_v53 = vpop.f32.mrf.mxu1  ;;  %v610_v54 = vmul.f32 -1.442695, %v312_v51  ;;  %v513_v5 = vadd.f32 %v720_v60, %v512_v52 }
  0xc8   :  { %725 = vpow2.f32 %v610_v54 }
  0xc9   :  { %v724_v55 = vpop.eup %723 }
  0xca   :  { %v200_v56 = vmul.f32 %v724_v55, %v198_v48  ;;  %vm205_vm2 = vweird.f32 %v724_v55 }
  0xcb   :  { %v313_v57 = vpop.f32.mrf.mxu0  ;;  %vm206_vm4 = vmor %vm204_vm3, %vm205_vm2 }
  0xcc   :  { %v201_v59 = vsub.f32 1.0, %v200_v56 }
  0xcd   :  { %v514_v61 = vpop.f32.mrf.mxu3 }
  0xce   :  { %v726_v63 = vpop.eup %725  ;;  %v202_v0 = vmul.f32 %v724_v55, %v201_v59 }
  0xcf   :  { %v318_v2 = vadd.f32 1.0, %v726_v63 }
  0xd0   :  { %v203_v4 = vadd.f32 %v724_v55, %v202_v0 }
  0xd1   :  { %727 = vrcp.f32 %v318_v2  ;;  %v330_v15 = vand.u32 2147483648, %v318_v2  ;;  %v328_v17 = vand.u32 2147483647, %v318_v2  ;;  %vm324_vm7 = vweird.f32 %v318_v2 }
  0xd2   :  { %v207_v7 = vsel %vm206_vm4, %v724_v55, %v203_v4 }
  0xd3   :  { %v212_v8 = vsel %vm209_vm5, %v211_v6, %v207_v7  ;;  %v331_v21 = vor.u32 1.1754944e-38, %v330_v15  ;;  %vm329_vm9 = vcmp.eq.f32.partialorder %v328_v17, 8.507059e+37 }
  0xd4   :  { %v516_v10 = vmul.f32 %v513_v5, %v212_v8 }
  0xd6   :  { %v517_v11 = vadd.f32 %v516_v10, %v432_v9 }
  0xd7   :  { %v728_v12 = vpop.eup %727 }
  0xd8   :  { %v320_v13 = vmul.f32 %v728_v12, %v318_v2  ;;  %729 = vtanh.f32 %v517_v11  ;;  %vm325_vm6 = vweird.f32 %v728_v12 }
  0xd9   :  { %vm326_vm8 = vmor %vm324_vm7, %vm325_vm6 }
  0xda   :  { %v321_v14 = vsub.f32 1.0, %v320_v13 }
  0xdc   :  { %v322_v16 = vmul.f32 %v728_v12, %v321_v14 }
  0xde   :  { %v323_v19 = vadd.f32 %v728_v12, %v322_v16  ;;  %v730_v20 = vpop.eup %729 }
  0xdf   :  { %v520_v25 = vsub.f32 %v730_v20, %v82_v18 }
  0xe0   :  { %v327_v22 = vsel %vm326_vm8, %v728_v12, %v323_v19 }
  0xe1   :  { %v332_v23 = vsel %vm329_vm9, %v331_v21, %v327_v22 }
  0xe2   :  { %v519_v24 = vsub.f32 1.0, %v332_v23 }
  0xe4   :  { %v521_v26 = vmul.f32 %v520_v25, %v519_v24 }
  0xe6   :  { %v522_v27 = vadd.f32 %v521_v26, %v82_v18 }
  0xe8   :  { %523 = vst [vmem:[#allocation10] sm:$0xff] %v522_v27 }
  0xe9   :  { %534 = dma.vmem_to_hbm [thread:$0]  %s530_s15, 128, %s532_s18, [#allocation4]  }
  0xea   :  { %857 = dma.done.wait [#allocation4], 128  }
  0xeb   :  { %858 = vsyncadd [#allocation4], 4294967168 }
  0xec   :  { %539 = vsyncpa [#allocation3], 1 }
  0xed   :  { %540 = vsyncpa [#allocation6], 1 }
  0xee   :  { %541 = vsyncpa [#allocation9], 1 }
  0xef   :  { %542 = vsyncpa [#allocation4], 1 }

</bundles_post_ra>
